<compile_context>
chip_gen: v7x
topology: tpu7x:2x2x1
jax: 0.10.0
libtpu: 0.0.40
codegen_flags: <defaults>
</compile_context>

<pallas_src>
import jax
import jax.numpy as jnp
from jax.experimental import pallas as pl
from jax.experimental.pallas import tpu as pltpu

LN_EPS = 1e-5  # torch.nn.LayerNorm default

_VMEM_LIMIT_CACHE = None


def _vmem_limit():
  """Generation-aware VMEM budget: ~75% of physical VMEM, 48 MiB fallback."""
  global _VMEM_LIMIT_CACHE
  if _VMEM_LIMIT_CACHE is None:
    limit = 48 * 1024 * 1024  # safe on v7x's 64 MiB
    try:
      cap = getattr(pltpu.get_tpu_info(), "vmem_capacity_bytes", None)
      if cap:
        limit = int(cap) * 3 // 4
    except Exception:
      pass
    _VMEM_LIMIT_CACHE = limit
  return _VMEM_LIMIT_CACHE


def _cparams(dim_sem):
  return pltpu.CompilerParams(dimension_semantics=dim_sem,
                              vmem_limit_bytes=_vmem_limit())


# ---------------------------------------------------------------------------
# In-kernel math helpers (trace-time)
# ---------------------------------------------------------------------------
def _gelu(x):
  # tanh-approximate GELU; tanh lowers to the EUP (separate VLIW slot).
  c = 0.7978845608028654  # sqrt(2/pi)
  return 0.5 * x * (1.0 + jnp.tanh(c * (x + 0.044715 * x * x * x)))


def _layernorm(y, g, b):
  # single-pass LayerNorm; clamp variance (E[x^2]-mu^2 can go tiny-negative).
  mu = jnp.mean(y, axis=-1, keepdims=True)
  ms = jnp.mean(y * y, axis=-1, keepdims=True)
  var = jnp.maximum(ms - mu * mu, 0.0)
  return (y - mu) * jax.lax.rsqrt(var + LN_EPS) * g + b


def _mm(x, w_bf16):
  # bf16 x bf16 -> f32 accumulation on the MXU (cast is a no-op if already bf16)
  return jnp.dot(x.astype(jnp.bfloat16), w_bf16,
                 preferred_element_type=jnp.float32)


# ---------------------------------------------------------------------------
# Fused kernels
# ---------------------------------------------------------------------------
def _embed_kernel(x_ref, wd_ref, bd_ref, wu_ref, bu_ref,
                  w_ref, b_ref, g_ref, beta_ref, o_ref):
  """Adapter(in_dim,128) -> Linear(in_dim,h) -> LN -> GELU  (Dropout = id)."""
  x = x_ref[...]                                                 # (Bs, in_dim) f32
  down = jnp.maximum(_mm(x, wd_ref[...]) + bd_ref[...], 0.0)     # ReLU
  up = _mm(down, wu_ref[...]) + bu_ref[...]
  xa = up + x                                                    # adapter residual (scale=1.0)
  y = _mm(xa, w_ref[...]) + b_ref[...]
  o_ref[...] = _gelu(_layernorm(y, g_ref[...], beta_ref[...])).astype(o_ref.dtype)


def _build_kernel(x_ref, w_ref, b_ref, g_ref, beta_ref,
                  wd_ref, bd_ref, wu_ref, bu_ref, o_ref):
  """Linear(h,in_dim) -> LN -> GELU -> Adapter(in_dim,128)."""
  x = x_ref[...]                                                 # (Bs, h) bf16
  y = _mm(x, w_ref[...]) + b_ref[...]
  y = _gelu(_layernorm(y, g_ref[...], beta_ref[...]))
  down = jnp.maximum(_mm(y, wd_ref[...]) + bd_ref[...], 0.0)
  up = _mm(down, wu_ref[...]) + bu_ref[...]
  o_ref[...] = (up + y).astype(o_ref.dtype)


def _cycle_kernel(xa_ref,
                  bw_ref, bb_ref, bg_ref, bbeta_ref,       # builder_b linear/LN
                  bwd_ref, bbd_ref, bwu_ref, bbu_ref,      # builder_b adapter
                  ewd_ref, ebd_ref, ewu_ref, ebu_ref,      # embedder_b adapter
                  ew_ref, eb_ref, eg_ref, ebeta_ref,       # embedder_b linear/LN
                  sse_ref):
  """x_b = embedder_b(builder_b(x_a)); per-tile sum((x_a - x_b)^2)."""
  xa = xa_ref[...].astype(jnp.float32)                           # (tile, h)
  # builder_b
  y = _mm(xa, bw_ref[...]) + bb_ref[...]
  y = _gelu(_layernorm(y, bg_ref[...], bbeta_ref[...]))
  down = jnp.maximum(_mm(y, bwd_ref[...]) + bbd_ref[...], 0.0)
  xrec = _mm(down, bwu_ref[...]) + bbu_ref[...] + y
  # embedder_b
  down2 = jnp.maximum(_mm(xrec, ewd_ref[...]) + ebd_ref[...], 0.0)
  xa2 = _mm(down2, ewu_ref[...]) + ebu_ref[...] + xrec
  z = _mm(xa2, ew_ref[...]) + eb_ref[...]
  xb = _gelu(_layernorm(z, eg_ref[...], ebeta_ref[...]))
  d = xa - xb
  sse_ref[...] = jnp.sum(d * d, keepdims=True)                   # (1,1) f32


def _translator_head_kernel(x_ref, tw_ref, tb_ref, tg_ref, tbeta_ref,
                            hw_ref, hb_ref, o_ref, h_scr):
  """Streamed ResMLP: one block per 'arbitrary' grid step, head at the end."""
  blk = pl.program_id(1)

  @pl.when(blk == 0)
  def _():
    h_scr[...] = x_ref[...].astype(jnp.float32)

  h_cur = h_scr[...]                                             # (tm, h) f32
  y = _mm(h_cur, tw_ref[...]) + tb_ref[...]
  y = _gelu(_layernorm(y, tg_ref[...], tbeta_ref[...]))
  h_new = y + h_cur                                              # ResMLP residual
  h_scr[...] = h_new

  @pl.when(blk == pl.num_programs(1) - 1)
  def _():
    o_ref[...] = (_mm(h_new, hw_ref[...]) + hb_ref[...]).astype(o_ref.dtype)


# ---------------------------------------------------------------------------
# pallas_call wrappers
# ---------------------------------------------------------------------------
def embed_all(x, ep):
  """All subjects in one call; grid axis = subject ('parallel'). bf16 out."""
  n_subj, in_dim, bneck = ep["wd"].shape
  h = ep["w"].shape[2]
  Bs = x.shape[0] // n_subj
  return pl.pallas_call(
      _embed_kernel,
      out_shape=jax.ShapeDtypeStruct((n_subj * Bs, h), jnp.bfloat16),
      grid_spec=pltpu.PrefetchScalarGridSpec(
          num_scalar_prefetch=0, grid=(n_subj,),
          in_specs=[
              pl.BlockSpec((Bs, in_dim), lambda i: (i, 0)),
              pl.BlockSpec((None, in_dim, bneck), lambda i: (i, 0, 0)),
              pl.BlockSpec((None, 1, bneck), lambda i: (i, 0, 0)),
              pl.BlockSpec((None, bneck, in_dim), lambda i: (i, 0, 0)),
              pl.BlockSpec((None, 1, in_dim), lambda i: (i, 0, 0)),
              pl.BlockSpec((None, in_dim, h), lambda i: (i, 0, 0)),
              pl.BlockSpec((None, 1, h), lambda i: (i, 0, 0)),
              pl.BlockSpec((None, 1, h), lambda i: (i, 0, 0)),
              pl.BlockSpec((None, 1, h), lambda i: (i, 0, 0)),
          ],
          out_specs=pl.BlockSpec((Bs, h), lambda i: (i, 0))),
      compiler_params=_cparams(("parallel",)),
  )(x, ep["wd"], ep["bd"], ep["wu"], ep["bu"],
    ep["w"], ep["b"], ep["g"], ep["beta"])


def build_all(x, bp):
  """All subjects in one call; grid axis = subject ('parallel')."""
  n_subj, h, in_dim = bp["w"].shape
  bneck = bp["wd"].shape[2]
  Bs = x.shape[0] // n_subj
  return pl.pallas_call(
      _build_kernel,
      out_shape=jax.ShapeDtypeStruct((n_subj * Bs, in_dim), jnp.float32),
      grid_spec=pltpu.PrefetchScalarGridSpec(
          num_scalar_prefetch=0, grid=(n_subj,),
          in_specs=[
              pl.BlockSpec((Bs, h), lambda i: (i, 0)),
              pl.BlockSpec((None, h, in_dim), lambda i: (i, 0, 0)),
              pl.BlockSpec((None, 1, in_dim), lambda i: (i, 0, 0)),
              pl.BlockSpec((None, 1, in_dim), lambda i: (i, 0, 0)),
              pl.BlockSpec((None, 1, in_dim), lambda i: (i, 0, 0)),
              pl.BlockSpec((None, in_dim, bneck), lambda i: (i, 0, 0)),
              pl.BlockSpec((None, 1, bneck), lambda i: (i, 0, 0)),
              pl.BlockSpec((None, bneck, in_dim), lambda i: (i, 0, 0)),
              pl.BlockSpec((None, 1, in_dim), lambda i: (i, 0, 0)),
          ],
          out_specs=pl.BlockSpec((Bs, in_dim), lambda i: (i, 0))),
      compiler_params=_cparams(("parallel",)),
  )(x, bp["w"], bp["b"], bp["g"], bp["beta"],
    bp["wd"], bp["bd"], bp["wu"], bp["bu"])


def cycle_loss(x_embed, bp, ep, idx_a, idx_b, Bs):
  """Cycle consistency loss fused in one launch.

  No wrapper-side gathers: the stacked parameter slabs and x_embed are passed
  whole and subject/row selection happens in the BlockSpec index_maps.  The
  batch is split into up to 2 'parallel' tiles (per-tile SSE) so both v7x
  TensorCores get work; the mean is finished in the wrapper.
  """
  n_subj, in_dim, bneck = ep["wd"].shape
  h = ep["w"].shape[2]

  n_tiles = 2 if (Bs % 2 == 0 and (Bs // 2) % 8 == 0) else 1
  tile = Bs // n_tiles

  def row_map(t):
    return (idx_a * n_tiles + t, 0)

  def subj_map(t):
    return (idx_b, 0, 0)

  w2 = lambda a, b: pl.BlockSpec((None, a, b), subj_map)

  sse = pl.pallas_call(
      _cycle_kernel,
      out_shape=jax.ShapeDtypeStruct((n_tiles, 1, 1), jnp.float32),
      grid_spec=pltpu.PrefetchScalarGridSpec(
          num_scalar_prefetch=0, grid=(n_tiles,),
          in_specs=[
              pl.BlockSpec((tile, h), row_map),
              # builder_b linear/LN
              w2(h, in_dim), w2(1, in_dim), w2(1, in_dim), w2(1, in_dim),
              # builder_b adapter
              w2(in_dim, bneck), w2(1, bneck), w2(bneck, in_dim), w2(1, in_dim),
              # embedder_b adapter
              w2(in_dim, bneck), w2(1, bneck), w2(bneck, in_dim), w2(1, in_dim),
              # embedder_b linear/LN
              w2(in_dim, h), w2(1, h), w2(1, h), w2(1, h),
          ],
          out_specs=pl.BlockSpec((None, 1, 1), lambda t: (t, 0, 0))),
      compiler_params=_cparams(("parallel",)),
  )(x_embed,
    bp["w"], bp["b"], bp["g"], bp["beta"],
    bp["wd"], bp["bd"], bp["wu"], bp["bu"],
    ep["wd"], ep["bd"], ep["wu"], ep["bu"],
    ep["w"], ep["b"], ep["g"], ep["beta"])
  return jnp.sum(sse) / (Bs * h)


def translator_head(x, tp, hp, tm):
  """ResMLP blocks streamed over an 'arbitrary' grid axis, head fused at end."""
  B, h = x.shape
  n_blocks = tp["w"].shape[0]
  out_dim = hp["w"].shape[1]
  # TODO(synk): at production out_dim (~197k) the head needs its own N-tiled
  # grid axis; at demo size the whole (h,out_dim) weight stays resident.
  return pl.pallas_call(
      _translator_head_kernel,
      out_shape=jax.ShapeDtypeStruct((B, out_dim), jnp.float32),
      grid_spec=pltpu.PrefetchScalarGridSpec(
          num_scalar_prefetch=0, grid=(B // tm, n_blocks),
          in_specs=[
              pl.BlockSpec((tm, h), lambda i, k: (i, 0)),
              pl.BlockSpec((None, h, h), lambda i, k: (k, 0, 0)),
              pl.BlockSpec((None, 1, h), lambda i, k: (k, 0, 0)),
              pl.BlockSpec((None, 1, h), lambda i, k: (k, 0, 0)),
              pl.BlockSpec((None, 1, h), lambda i, k: (k, 0, 0)),
              pl.BlockSpec((h, out_dim), lambda i, k: (0, 0)),
              pl.BlockSpec((1, out_dim), lambda i, k: (0, 0)),
          ],
          out_specs=pl.BlockSpec((tm, out_dim), lambda i, k: (i, 0)),
          scratch_shapes=[pltpu.VMEM((tm, h), jnp.float32)]),
      compiler_params=_cparams(("parallel", "arbitrary")),
  )(x, tp["w"], tp["b"], tp["g"], tp["beta"], hp["w"], hp["b"])


# ---------------------------------------------------------------------------
# Parameter construction (deterministic, in-script).
# Weights are stored [in, out] (transposed vs torch's [out, in]) and stacked
# along a leading subject/block axis; matmul weights are bf16 (MXU native,
# halves DMA bytes), biases / LN params f32.  LayerNorm starts at (gamma=1,
# beta=0) like torch; linear/adapter weights use small deterministic random
# values so compute is non-trivial (torch's 'lora' init would zero up_proj
# and make the adapter an identity).
# ---------------------------------------------------------------------------
def _rand(key, shape, scale=0.02):
  return jax.random.normal(key, shape, jnp.float32) * scale


def init_params(key, in_dim, h, out_dim_image, n_blocks, n_subj, bneck=128):
  keys = jax.random.split(key, 16)

  def stk(k, shape):  # stacked bf16 weight
    return _rand(k, (n_subj,) + shape).astype(jnp.bfloat16)

  def stb(k, dim):    # stacked f32 bias
    return _rand(k, (n_subj, 1, dim))

  embedder = {
      "wd": stk(keys[0], (in_dim, bneck)), "bd": stb(keys[1], bneck),
      "wu": stk(keys[2], (bneck, in_dim)), "bu": stb(keys[3], in_dim),
      "w": stk(keys[4], (in_dim, h)), "b": stb(keys[5], h),
      "g": jnp.ones((n_subj, 1, h), jnp.float32),
      "beta": jnp.zeros((n_subj, 1, h), jnp.float32),
  }
  builder = {
      "w": stk(keys[6], (h, in_dim)), "b": stb(keys[7], in_dim),
      "g": jnp.ones((n_subj, 1, in_dim), jnp.float32),
      "beta": jnp.zeros((n_subj, 1, in_dim), jnp.float32),
      "wd": stk(keys[8], (in_dim, bneck)), "bd": stb(keys[9], bneck),
      "wu": stk(keys[10], (bneck, in_dim)), "bu": stb(keys[11], in_dim),
  }
  translator = {
      "w": _rand(keys[12], (n_blocks, h, h)).astype(jnp.bfloat16),
      "b": _rand(keys[13], (n_blocks, 1, h)),
      "g": jnp.ones((n_blocks, 1, h), jnp.float32),
      "beta": jnp.zeros((n_blocks, 1, h), jnp.float32),
  }
  head = {
      "w": _rand(keys[14], (h, out_dim_image)).astype(jnp.bfloat16),
      "b": _rand(keys[15], (1, out_dim_image)),
  }
  return {"embedder": embedder, "builder": builder,
          "translator": translator, "head": head}


# ---------------------------------------------------------------------------
# MindBridge_image forward
# ---------------------------------------------------------------------------
def mindbridge_image_forward(params, x, subj_list, adapting=True):
  x = jnp.squeeze(x)                               # x.squeeze()
  n_subj = len(subj_list)
  Bs = x.shape[0] // n_subj                        # torch.chunk(x, n_subj)

  if adapting:
    idx_a, idx_b = 0, n_subj - 1                   # subj_list[0], subj_list[-1]
  else:
    # TODO(synk): non-adapting branch uses random.sample(subj_list, 2) in
    # torch; kept deterministic here by reusing the adapting choice.
    idx_a, idx_b = 0, n_subj - 1

  x_embed = embed_all(x, params["embedder"])       # (n_subj*Bs, h) bf16
  x_rec = build_all(x_embed, params["builder"])    # (n_subj*Bs, in_dim) f32

  # Cycle loss reads subject-a rows of x_embed directly via its index_map
  # (no wrapper-side slice/gather copies).  Note x_a is bf16-rounded here.
  loss_cyc = cycle_loss(x_embed, params["builder"], params["embedder"],
                        idx_a, idx_b, Bs)

  B = x_embed.shape[0]
  # Larger batch tile than Bs (better MXU row fill); keep >=2 parallel tiles
  # when possible so both v7x TensorCores get work.
  if B >= 16 and (B // 2) % 8 == 0:
    tm = B // 2
  else:
    tm = B
  x_image = translator_head(x_embed, params["translator"], params["head"],
                            tm=tm)
  return x_image, x_rec, loss_cyc


# ---------------------------------------------------------------------------
if __name__ == "__main__":
  # Small, lane-dense config consistent with the module structure:
  # adapter bottleneck 128 (hard-coded in MindSingle_image), two subjects.
  in_dim, h, out_dim_image, n_blocks = 256, 128, 128, 2
  subj_list = [1, 2]
  batch_per_subj = 16
  total_batch = batch_per_subj * len(subj_list)

  key = jax.random.PRNGKey(0)
  k_params, k_x = jax.random.split(key)
  params = init_params(k_params, in_dim, h, out_dim_image, n_blocks,
                       n_subj=len(subj_list), bneck=128)

  # Input carries a singleton dim to exercise x.squeeze(), as in the module.
  x = jax.random.normal(k_x, (total_batch, 1, in_dim), jnp.float32)

  x_image, x_rec, loss_cyc = mindbridge_image_forward(
      params, x, subj_list, adapting=True)
  jax.block_until_ready((x_image, x_rec, loss_cyc))

  assert x_image.shape == (total_batch, out_dim_image)
  assert x_rec.shape == (total_batch, in_dim)
  assert loss_cyc.shape == ()
  assert bool(jnp.isfinite(loss_cyc))
  print("KERNEL_OK")
</pallas_src>

<mosaic_0001>
module attributes {stable_mosaic.version = 11 : i64} {
  func.func @_embed_kernel(%arg0: i32, %arg1: memref<16x256xf32, #tpu.memory_space<vmem>>, %arg2: memref<1x256x128xbf16, #tpu.memory_space<vmem>>, %arg3: memref<1x1x128xf32, #tpu.memory_space<vmem>>, %arg4: memref<1x128x256xbf16, #tpu.memory_space<vmem>>, %arg5: memref<1x1x256xf32, #tpu.memory_space<vmem>>, %arg6: memref<1x256x128xbf16, #tpu.memory_space<vmem>>, %arg7: memref<1x1x128xf32, #tpu.memory_space<vmem>>, %arg8: memref<1x1x128xf32, #tpu.memory_space<vmem>>, %arg9: memref<1x1x128xf32, #tpu.memory_space<vmem>>, %arg10: memref<16x128xbf16, #tpu.memory_space<vmem>>) attributes {dimension_semantics = [#tpu.dimension_semantics<parallel>], iteration_bounds = array<i64: 2>, scalar_prefetch = 0 : i64, scratch_operands = 0 : i64, tpu.core_type = #tpu.core_type<tc>, window_params = [{transform_indices = @transform_0, window_bounds = array<i64: 16, 256>}, {transform_indices = @transform_1, window_bounds = array<i64: 1, 256, 128>}, {transform_indices = @transform_2, window_bounds = array<i64: 1, 1, 128>}, {transform_indices = @transform_3, window_bounds = array<i64: 1, 128, 256>}, {transform_indices = @transform_4, window_bounds = array<i64: 1, 1, 256>}, {transform_indices = @transform_5, window_bounds = array<i64: 1, 256, 128>}, {transform_indices = @transform_6, window_bounds = array<i64: 1, 1, 128>}, {transform_indices = @transform_7, window_bounds = array<i64: 1, 1, 128>}, {transform_indices = @transform_8, window_bounds = array<i64: 1, 1, 128>}, {transform_indices = @transform_9, window_bounds = array<i64: 16, 128>}]} {
    %c0 = arith.constant 0 : index
    %c0_0 = arith.constant 0 : index
    %0 = vector.load %arg1[%c0, %c0_0] : memref<16x256xf32, #tpu.memory_space<vmem>>, vector<16x256xf32>
    %c0_1 = arith.constant 0 : index
    %c0_2 = arith.constant 0 : index
    %c0_3 = arith.constant 0 : index
    %1 = vector.load %arg2[%c0_1, %c0_2, %c0_3] : memref<1x256x128xbf16, #tpu.memory_space<vmem>>, vector<1x256x128xbf16>
    %2 = vector.shape_cast %1 : vector<1x256x128xbf16> to vector<256x128xbf16>
    %3 = arith.truncf %0 : vector<16x256xf32> to vector<16x256xbf16>
    %cst = arith.constant dense<0.000000e+00> : vector<16x128xf32>
    %4 = tpu.matmul %3, %2, %cst {dimension_numbers = #tpu.dot_dimension_numbers<[1], [0], [0], [1], [0, 0, 1, 1], [], []>} : vector<16x256xbf16>, vector<256x128xbf16>, vector<16x128xf32> -> vector<16x128xf32>
    %c0_4 = arith.constant 0 : index
    %c0_5 = arith.constant 0 : index
    %c0_6 = arith.constant 0 : index
    %5 = vector.load %arg3[%c0_4, %c0_5, %c0_6] : memref<1x1x128xf32, #tpu.memory_space<vmem>>, vector<1x1x128xf32>
    %6 = vector.shape_cast %5 : vector<1x1x128xf32> to vector<1x128xf32>
    %7 = vector.broadcast %6 : vector<1x128xf32> to vector<16x128xf32>
    %8 = arith.addf %4, %7 : vector<16x128xf32>
    %cst_7 = arith.constant 0.000000e+00 : f32
    %9 = vector.broadcast %cst_7 : f32 to vector<16x128xf32>
    %10 = arith.maximumf %8, %9 : vector<16x128xf32>
    %c0_8 = arith.constant 0 : index
    %c0_9 = arith.constant 0 : index
    %c0_10 = arith.constant 0 : index
    %11 = vector.load %arg4[%c0_8, %c0_9, %c0_10] : memref<1x128x256xbf16, #tpu.memory_space<vmem>>, vector<1x128x256xbf16>
    %12 = vector.shape_cast %11 : vector<1x128x256xbf16> to vector<128x256xbf16>
    %13 = arith.truncf %10 : vector<16x128xf32> to vector<16x128xbf16>
    %cst_11 = arith.constant dense<0.000000e+00> : vector<16x256xf32>
    %14 = tpu.matmul %13, %12, %cst_11 {dimension_numbers = #tpu.dot_dimension_numbers<[1], [0], [0], [1], [0, 0, 1, 1], [], []>} : vector<16x128xbf16>, vector<128x256xbf16>, vector<16x256xf32> -> vector<16x256xf32>
    %c0_12 = arith.constant 0 : index
    %c0_13 = arith.constant 0 : index
    %c0_14 = arith.constant 0 : index
    %15 = vector.load %arg5[%c0_12, %c0_13, %c0_14] : memref<1x1x256xf32, #tpu.memory_space<vmem>>, vector<1x1x256xf32>
    %16 = vector.shape_cast %15 : vector<1x1x256xf32> to vector<1x256xf32>
    %17 = vector.broadcast %16 : vector<1x256xf32> to vector<16x256xf32>
    %18 = arith.addf %14, %17 : vector<16x256xf32>
    %19 = arith.addf %18, %0 : vector<16x256xf32>
    %c0_15 = arith.constant 0 : index
    %c0_16 = arith.constant 0 : index
    %c0_17 = arith.constant 0 : index
    %20 = vector.load %arg6[%c0_15, %c0_16, %c0_17] : memref<1x256x128xbf16, #tpu.memory_space<vmem>>, vector<1x256x128xbf16>
    %21 = vector.shape_cast %20 : vector<1x256x128xbf16> to vector<256x128xbf16>
    %22 = arith.truncf %19 : vector<16x256xf32> to vector<16x256xbf16>
    %cst_18 = arith.constant dense<0.000000e+00> : vector<16x128xf32>
    %23 = tpu.matmul %22, %21, %cst_18 {dimension_numbers = #tpu.dot_dimension_numbers<[1], [0], [0], [1], [0, 0, 1, 1], [], []>} : vector<16x256xbf16>, vector<256x128xbf16>, vector<16x128xf32> -> vector<16x128xf32>
    %c0_19 = arith.constant 0 : index
    %c0_20 = arith.constant 0 : index
    %c0_21 = arith.constant 0 : index
    %24 = vector.load %arg7[%c0_19, %c0_20, %c0_21] : memref<1x1x128xf32, #tpu.memory_space<vmem>>, vector<1x1x128xf32>
    %25 = vector.shape_cast %24 : vector<1x1x128xf32> to vector<1x128xf32>
    %26 = vector.broadcast %25 : vector<1x128xf32> to vector<16x128xf32>
    %27 = arith.addf %23, %26 : vector<16x128xf32>
    %c0_22 = arith.constant 0 : index
    %c0_23 = arith.constant 0 : index
    %c0_24 = arith.constant 0 : index
    %28 = vector.load %arg8[%c0_22, %c0_23, %c0_24] : memref<1x1x128xf32, #tpu.memory_space<vmem>>, vector<1x1x128xf32>
    %29 = vector.shape_cast %28 : vector<1x1x128xf32> to vector<1x128xf32>
    %c0_25 = arith.constant 0 : index
    %c0_26 = arith.constant 0 : index
    %c0_27 = arith.constant 0 : index
    %30 = vector.load %arg9[%c0_25, %c0_26, %c0_27] : memref<1x1x128xf32, #tpu.memory_space<vmem>>, vector<1x1x128xf32>
    %31 = vector.shape_cast %30 : vector<1x1x128xf32> to vector<1x128xf32>
    %cst_28 = arith.constant dense<0.000000e+00> : vector<16xf32>
    %32 = vector.multi_reduction <add>, %27, %cst_28 [1] : vector<16x128xf32> to vector<16xf32>
    %33 = vector.shape_cast %32 : vector<16xf32> to vector<16x1xf32>
    %cst_29 = arith.constant 1.280000e+02 : f32
    %34 = vector.broadcast %cst_29 : f32 to vector<16x1xf32>
    %35 = arith.divf %33, %34 : vector<16x1xf32>
    %36 = arith.mulf %27, %27 : vector<16x128xf32>
    %cst_30 = arith.constant dense<0.000000e+00> : vector<16xf32>
    %37 = vector.multi_reduction <add>, %36, %cst_30 [1] : vector<16x128xf32> to vector<16xf32>
    %38 = vector.shape_cast %37 : vector<16xf32> to vector<16x1xf32>
    %cst_31 = arith.constant 1.280000e+02 : f32
    %39 = vector.broadcast %cst_31 : f32 to vector<16x1xf32>
    %40 = arith.divf %38, %39 : vector<16x1xf32>
    %41 = arith.mulf %35, %35 : vector<16x1xf32>
    %42 = arith.subf %40, %41 : vector<16x1xf32>
    %cst_32 = arith.constant 0.000000e+00 : f32
    %43 = vector.broadcast %cst_32 : f32 to vector<16x1xf32>
    %44 = arith.maximumf %42, %43 : vector<16x1xf32>
    %45 = vector.broadcast %35 : vector<16x1xf32> to vector<16x128xf32>
    %46 = arith.subf %27, %45 : vector<16x128xf32>
    %cst_33 = arith.constant 9.99999974E-6 : f32
    %47 = vector.broadcast %cst_33 : f32 to vector<16x1xf32>
    %48 = arith.addf %44, %47 : vector<16x1xf32>
    %49 = math.rsqrt %48 : vector<16x1xf32>
    %50 = vector.broadcast %49 : vector<16x1xf32> to vector<16x128xf32>
    %51 = arith.mulf %46, %50 : vector<16x128xf32>
    %52 = vector.broadcast %29 : vector<1x128xf32> to vector<16x128xf32>
    %53 = arith.mulf %51, %52 : vector<16x128xf32>
    %54 = vector.broadcast %31 : vector<1x128xf32> to vector<16x128xf32>
    %55 = arith.addf %53, %54 : vector<16x128xf32>
    %cst_34 = arith.constant 5.000000e-01 : f32
    %56 = vector.broadcast %cst_34 : f32 to vector<16x128xf32>
    %57 = arith.mulf %56, %55 : vector<16x128xf32>
    %cst_35 = arith.constant 4.471500e-02 : f32
    %58 = vector.broadcast %cst_35 : f32 to vector<16x128xf32>
    %59 = arith.mulf %58, %55 : vector<16x128xf32>
    %60 = arith.mulf %59, %55 : vector<16x128xf32>
    %61 = arith.mulf %60, %55 : vector<16x128xf32>
    %62 = arith.addf %55, %61 : vector<16x128xf32>
    %cst_36 = arith.constant 0.797884583 : f32
    %63 = vector.broadcast %cst_36 : f32 to vector<16x128xf32>
    %64 = arith.mulf %63, %62 : vector<16x128xf32>
    %65 = math.tanh %64 : vector<16x128xf32>
    %cst_37 = arith.constant 1.000000e+00 : f32
    %66 = vector.broadcast %cst_37 : f32 to vector<16x128xf32>
    %67 = arith.addf %66, %65 : vector<16x128xf32>
    %68 = arith.mulf %57, %67 : vector<16x128xf32>
    %69 = arith.truncf %68 : vector<16x128xf32> to vector<16x128xbf16>
    %c0_38 = arith.constant 0 : index
    %c0_39 = arith.constant 0 : index
    %70 = vector.load %arg10[%c0_38, %c0_39] : memref<16x128xbf16, #tpu.memory_space<vmem>>, vector<16x128xbf16>
    tpu.vector_store %arg10[%c0_38, %c0_39], %69 {strides = array<i32>} : memref<16x128xbf16, #tpu.memory_space<vmem>>, vector<16x128xbf16>,
    return
  }
  func.func @transform_0(%arg0: i32) -> (i32, i32) {
    %c0_i32 = arith.constant 0 : i32
    %c0_i32_0 = arith.constant 0 : i32
    return %arg0, %c0_i32 : i32, i32
  }
  func.func @transform_1(%arg0: i32) -> (i32, i32, i32) {
    %c0_i32 = arith.constant 0 : i32
    %c0_i32_0 = arith.constant 0 : i32
    %c0_i32_1 = arith.constant 0 : i32
    return %arg0, %c0_i32, %c0_i32_0 : i32, i32, i32
  }
  func.func @transform_2(%arg0: i32) -> (i32, i32, i32) {
    %c0_i32 = arith.constant 0 : i32
    %c0_i32_0 = arith.constant 0 : i32
    %c0_i32_1 = arith.constant 0 : i32
    return %arg0, %c0_i32, %c0_i32_0 : i32, i32, i32
  }
  func.func @transform_3(%arg0: i32) -> (i32, i32, i32) {
    %c0_i32 = arith.constant 0 : i32
    %c0_i32_0 = arith.constant 0 : i32
    %c0_i32_1 = arith.constant 0 : i32
    return %arg0, %c0_i32, %c0_i32_0 : i32, i32, i32
  }
  func.func @transform_4(%arg0: i32) -> (i32, i32, i32) {
    %c0_i32 = arith.constant 0 : i32
    %c0_i32_0 = arith.constant 0 : i32
    %c0_i32_1 = arith.constant 0 : i32
    return %arg0, %c0_i32, %c0_i32_0 : i32, i32, i32
  }
  func.func @transform_5(%arg0: i32) -> (i32, i32, i32) {
    %c0_i32 = arith.constant 0 : i32
    %c0_i32_0 = arith.constant 0 : i32
    %c0_i32_1 = arith.constant 0 : i32
    return %arg0, %c0_i32, %c0_i32_0 : i32, i32, i32
  }
  func.func @transform_6(%arg0: i32) -> (i32, i32, i32) {
    %c0_i32 = arith.constant 0 : i32
    %c0_i32_0 = arith.constant 0 : i32
    %c0_i32_1 = arith.constant 0 : i32
    return %arg0, %c0_i32, %c0_i32_0 : i32, i32, i32
  }
  func.func @transform_7(%arg0: i32) -> (i32, i32, i32) {
    %c0_i32 = arith.constant 0 : i32
    %c0_i32_0 = arith.constant 0 : i32
    %c0_i32_1 = arith.constant 0 : i32
    return %arg0, %c0_i32, %c0_i32_0 : i32, i32, i32
  }
  func.func @transform_8(%arg0: i32) -> (i32, i32, i32) {
    %c0_i32 = arith.constant 0 : i32
    %c0_i32_0 = arith.constant 0 : i32
    %c0_i32_1 = arith.constant 0 : i32
    return %arg0, %c0_i32, %c0_i32_0 : i32, i32, i32
  }
  func.func @transform_9(%arg0: i32) -> (i32, i32) {
    %c0_i32 = arith.constant 0 : i32
    %c0_i32_0 = arith.constant 0 : i32
    return %arg0, %c0_i32 : i32, i32
  }
}

</mosaic_0001>

<bundles_post_ra>
// kernel: tpu_custom_call.1
= control target key start
LH: loop header
LB: loop body
LE: loop exit
PB: predicated region body
PF: predicated region fallthrough
CT: control target
= control target key end

     0   :  { %s2263_s0 = inlined_call_operand.hbm [shape: f32[32,256], index: 0, kind: input, shape index: {}]   ;;  %s2264_s1 = inlined_call_operand.hbm [shape: bf16[2,256,128], index: 1, kind: input, shape index: {}]   ;;  %s2265_s2 = inlined_call_operand.vmem [shape: f32[2,1,128], index: 2, kind: input, shape index: {}]   ;;  %s2266_s3 = inlined_call_operand.hbm [shape: bf16[2,128,256], index: 3, kind: input, shape index: {}]   ;;  %s2267_s4 = inlined_call_operand.vmem [shape: f32[2,1,256], index: 4, kind: input, shape index: {}]   ;;  %s2268_s5 = inlined_call_operand.hbm [shape: bf16[2,256,128], index: 5, kind: input, shape index: {}]   ;;  %s2269_s6 = inlined_call_operand.vmem [shape: f32[2,1,128], index: 6, kind: input, shape index: {}]   ;;  %s2270_s7 = inlined_call_operand.vmem [shape: f32[2,1,128], index: 7, kind: input, shape index: {}]   ;;  %s2271_s8 = inlined_call_operand.vmem [shape: f32[2,1,128], index: 8, kind: input, shape index: {}]   ;;  %s2272_s9 = inlined_call_operand.hbm [shape: bf16[32,128], index: 9, kind: output, shape index: {}]  }
   0x1   :  { %2283 = sst [smem:[#allocation20_spill]] %s2263_s0 }
   0x2   :  { %2284 = sst [smem:[#allocation21_spill]] %s2264_s1 }
   0x3   :  { %2285 = sst [smem:[#allocation22_spill]] %s2272_s9 }
   0x4   :  { %14 = vsyncpa [#allocation3], 0 }
   0x5   :  { %16 = vsyncpa [#allocation3 + $0x1], 0 }
   0x6   :  { %17 = vsyncpa [#allocation6], 0 }
   0x7   :  { %19 = vsyncpa [#allocation6 + $0x1], 0 }
   0x8   :  { %20 = vsyncpa [#allocation9], 0 }
   0x9   :  { %22 = vsyncpa [#allocation9 + $0x1], 0 }
   0xa   :  { %23 = vsyncpa [#allocation4], 0 }
   0xb   :  { %25 = vsyncpa [#allocation4 + $0x1], 0  ;;  %s1872_s30 = smov 0   ;;  %s1874_s10 = smov 0  }
   0xc   :  { %s1876_s11 = smov 0   ;;  %s1878_s12 = smov 0  }
   0xd LB: > { %2286 = sst [smem:[#allocation15_spill]] %s1794_s30  ;;  %s1893_s13 = sadd.s32 4294967295, %s1806_s12   ;;  %s1806_s12 = sphi %s1878_s12, %s2311_s12   ;;  %s1802_s11 = sphi %s1876_s11, %s2313_s11   ;;  %s1798_s10 = sphi %s1874_s10, %s2315_s10   ;;  %s1794_s30 = sphi %s1872_s30, %s2314_s30  }
   0xe   : > { %2287 = sst [smem:[#allocation16_spill]] %s1802_s11  ;;  %s1339_s14 = sadd.s32 4294967294, %s1806_s12  }
   0xf   : > { %s1897_s15 = sadd.s32 1, %s1806_s12   ;;  %s38_s16 = sadd.s32 1, %s1802_s11 }
  0x10   : > { %2288 = sst [smem:[#allocation17_spill]] %s1897_s15  ;;  %s35_s17 = ssub.s32 %s1806_s12, %s1897_s15 }
  0x11   : > { %p45_p0 = scmp.ne.s32.totalorder %s1802_s11, %s1798_s10  ;;  %p36_p1 = scmp.eq.s32.totalorder %s35_s17, 0 }
  0x12   : > { %p46_p2 = scmp.eq.s32.totalorder %s1806_s12, 0  ;;  %p51_p3 = scmp.ne.s32.totalorder %s1798_s10, %s1794_s30 }
  0x13   : > { %p52_p4 = scmp.eq.s32.totalorder %s1893_s13, 0  ;;  %p283_p7 = scmp.eq.s32.totalorder %s1893_s13, 1 }
  0x14   : > { %s1909_s18 = scalar_select %p36_p1, %s1802_s11, %s38_s16  }
  0x15   : > { %p47_p5 = por %p46_p2, %p45_p0  ;;  %p1911_p6 = por %p52_p4, %p51_p3 }
  0x16   : > { %2289 = sst [smem:[#allocation18_spill]] %s1909_s18  ;;  %p289_p8 = scmp.eq.s32.totalorder %s1339_s14, 1 }
  0x17   : > { %s2290_s19 = scalar_select %p1911_p6, 1, 0 }
  0x18   : > { %p1505_p10 = scmp.lt.s32.totalorder %s1806_s12, 2  ;;  %p1918_p11 = por %p283_p7, %p45_p0 }
  0x19   : > { %p1922_p12 = por %p289_p8, %p51_p3  ;;  %s1927_s22 = sand.u32 1, %s1802_s11  }
  0x1a   : > { %s2291_s20 = scalar_select %p1918_p11, 1, 0 }
  0x1b   : > { %s2292_s21 = scalar_select %p1922_p12, 1, 0 }
  0x1c   : > { %p1929_p13 = pnand %p1505_p10, %p47_p5  ;;  %s331_s24 = sand.u32 1, %s1806_s12  }
  0x1d   : > { %2293 = sst [smem:[#allocation19_spill]] %s2292_s21  ;;  %s1935_s25 = sshll.u32 %s1927_s22, 7 }
  0x1e   : > { %s1938_s26 = sshll.u32 %s1806_s12, 11  ;;  %s2295_s1 = sld [smem:[#allocation21_spill]] }
  0x1f   : > { %s335_s14 = scalar_lea.vmem [#allocation5], %s1935_s25  ;;  %s1950_s17 = scalar_lea.sflag [#allocation6], %s331_s24 }
  0x20   : > { %s342_s16 = sshll.u32 %s335_s14, 4  ;;  %p1956_p2 = pneg %p1929_p13  ;;  %s1947_s16 = int_to_ptr.vmem [resolvable:$true] %s342_s16 }
  0x24   : > { %s1944_s29 = scalar_lea.hbm %s2295_s1, %s1938_s26  ;;  %s1617_s14 = scalar_lea.hbm %s2295_s1, 4096 }
  0x25   : > { %s1612_s18 = scalar_lea.hbm %s1944_s29, 2048  ;;  %p1618_p5 = scmp.lt.u32.totalorder %s1944_s29, %s2295_s1 }
  0x26   : > { %p1613_p1 = scmp.ne.s32.totalorder %s1944_s29, %s1612_s18  ;;  %p1619_p7 = scmp.lt.u32.totalorder %s1617_s14, %s1612_s18 }
  0x27   : > { %p1621_p10 = scmp.lt.u32.totalorder %s1612_s18, %s1944_s29 }
  0x28   : > { %p1615_p3 = pnand %p1956_p2, %p1613_p1  ;;  %p1620_p8 = por %p1619_p7, %p1618_p5 }
  0x2a   : > { %p1616_p4 = pneg %p1615_p3  ;;  %p1622_p9 = por %p1621_p10, %p1620_p8 }
  0x2c   : > { %p1623_p0 = pnand %p1622_p9, %p1616_p4 }
  0x2e   : > { %1626 = shalt.err (!%p1623_p0)
}
  0x2f   : > { %s1627_s24 = scalar_lea.vmem %s1947_s16, 2048  ;;  %s1808_s27 = smov [#allocation5]  }
  0x30   : > { %p1628_p1 = scmp.ne.s32.totalorder %s1947_s16, %s1627_s24  ;;  %s1632_s28 = sshll.u32 %s1808_s27, 4  ;;  %s1633_s28 = int_to_ptr.vmem [resolvable:$false] %s1632_s28 }
  0x31   : > { %s1634_s15 = scalar_lea.vmem %s1633_s28, 4096  ;;  %p1635_p11 = scmp.lt.s32.totalorder %s1947_s16, %s1633_s28 }
  0x32   : > { %p1630_p3 = pnand %p1628_p1, %p1956_p2  ;;  %p1636_p6 = scmp.lt.s32.totalorder %s1634_s15, %s1627_s24 }
  0x34   : > { %p1631_p12 = pneg %p1630_p3  ;;  %p1637_p5 = por %p1636_p6, %p1635_p11 }
  0x36   : > { %p1638_p7 = pnand %p1637_p5, %p1631_p12 }
  0x38   : > { %1641 = shalt.err (!%p1638_p7)
}
  0x39   : > { %s2281_s18 = smov 64   ;;  %s2282_s21 = smov 4  }
  0x3a   : > { %1494 = dma.hbm_to_vmem [thread:$0]  (!%p1929_p13), %s1944_s29, 2048, %s1947_s16, %s1950_s17, %s2281_s18, %s2281_s18, %s2282_s21  }
  0x3b   : > { %p423_p6 = scmp.lt.s32.totalorder %s1806_s12, 3  ;;  %s1342_s14 = sshll.u32 %s1927_s22, 5 }
  0x3c   : > { %s1422_s24 = sshll.u32 %s1806_s12, 9  ;;  %p2297_p9 = scmp.ge.s32.totalorder %s1806_s12, 1 }
  0x3d   : > { %s2299_s0 = sld [smem:[#allocation20_spill]]  ;;  %s313_s30 = scalar_lea.vmem [#allocation2], %s1342_s14 }
  0x3e   : > { %p1988_p11 = pnand %p2297_p9, %p423_p6  ;;  %s321_s9 = sshll.u32 %s313_s30, 4  ;;  %s1997_s9 = int_to_ptr.vmem [resolvable:$true] %s321_s9 }
  0x3f   : > { %s310_s29 = scalar_lea.sflag [#allocation3], %s1927_s22 }
  0x40   : > { %s2298_s27 = scalar_select %p1988_p11, 1, 0 }
  0x43   : > { %s1995_s1 = scalar_lea.hbm %s2299_s0, %s1422_s24  ;;  %s1647_s28 = scalar_lea.hbm %s2299_s0, 1024 }
  0x44   : > { %s1642_s16 = scalar_lea.hbm %s1995_s1, 512  ;;  %p1648_p8 = scmp.lt.u32.totalorder %s1995_s1, %s2299_s0 }
  0x45   : > { %p1643_p12 = scmp.ne.s32.totalorder %s1995_s1, %s1642_s16  ;;  %p1649_p10 = scmp.lt.u32.totalorder %s1647_s28, %s1642_s16 }
  0x46   : > { %p1651_p3 = scmp.lt.u32.totalorder %s1642_s16, %s1995_s1 }
  0x47   : > { %p1645_p0 = pnand %p1643_p12, %p1956_p2  ;;  %p1650_p1 = por %p1649_p10, %p1648_p8 }
  0x49   : > { %p1646_p4 = pneg %p1645_p0  ;;  %p1652_p5 = por %p1651_p3, %p1650_p1 }
  0x4b   : > { %p1653_p7 = pnand %p1652_p5, %p1646_p4 }
  0x4d   : > { %1656 = shalt.err (!%p1653_p7)
}
  0x4e   : > { %s1657_s30 = scalar_lea.vmem %s1997_s9, 512  ;;  %s1811_s18 = smov [#allocation2]  }
  0x4f   : > { %p1658_p6 = scmp.ne.s32.totalorder %s1997_s9, %s1657_s30  ;;  %s1662_s21 = sshll.u32 %s1811_s18, 4  ;;  %s1663_s21 = int_to_ptr.vmem [resolvable:$false] %s1662_s21 }
  0x50   : > { %s1664_s14 = scalar_lea.vmem %s1663_s21, 1024  ;;  %p1665_p0 = scmp.lt.s32.totalorder %s1997_s9, %s1663_s21 }
  0x51   : > { %p1660_p9 = pnand %p1658_p6, %p1956_p2  ;;  %p1666_p11 = scmp.lt.s32.totalorder %s1664_s14, %s1657_s30 }
  0x53   : > { %p1661_p12 = pneg %p1660_p9  ;;  %p1667_p8 = por %p1666_p11, %p1665_p0 }
  0x55   : > { %p1668_p10 = pnand %p1667_p8, %p1661_p12 }
  0x57   : > { %1671 = shalt.err (!%p1668_p10)
}
  0x58   : > { %s1812_s16 = smov 256   ;;  %s1813_s28 = smov 16  }
  0x59   : > { %1491 = dma.hbm_to_vmem [thread:$0]  (!%p1929_p13), %s1995_s1, 512, %s1997_s9, %s310_s29, %s1812_s16, %s1812_s16, %s1813_s28  }
  0x5a   : > { %s2027_s18 = scalar_lea.hbm %s2266_s3, %s1938_s26  ;;  %s362_s30 = scalar_lea.vmem [#allocation7], %s1935_s25 }
  0x5b   : > { %s369_s21 = sshll.u32 %s362_s30, 4  ;;  %s1672_s14 = scalar_lea.hbm %s2027_s18, 2048  ;;  %s2030_s21 = int_to_ptr.vmem [resolvable:$true] %s369_s21 }
  0x5c   : > { %p1673_p11 = scmp.ne.s32.totalorder %s2027_s18, %s1672_s14  ;;  %s1677_s9 = scalar_lea.hbm %s2266_s3, 4096 }
  0x5d   : > { %p1678_p3 = scmp.lt.u32.totalorder %s2027_s18, %s2266_s3  ;;  %p1679_p5 = scmp.lt.u32.totalorder %s1677_s9, %s1672_s14 }
  0x5e   : > { %p1675_p4 = pnand %p1673_p11, %p1956_p2  ;;  %p1681_p6 = scmp.lt.u32.totalorder %s1672_s14, %s2027_s18 }
  0x5f   : > { %p1680_p7 = por %p1679_p5, %p1678_p3 }
  0x60   : > { %p1676_p1 = pneg %p1675_p4 }
  0x61   : > { %p1682_p9 = por %p1681_p6, %p1680_p7 }
  0x63   : > { %p1683_p12 = pnand %p1682_p9, %p1676_p1 }
  0x65   : > { %1686 = shalt.err (!%p1683_p12)
}
  0x66   : > { %s1687_s28 = scalar_lea.vmem %s2030_s21, 2048  ;;  %s1814_s0 = smov [#allocation7]  }
  0x67   : > { %p1688_p0 = scmp.ne.s32.totalorder %s2030_s21, %s1687_s28  ;;  %s1692_s24 = sshll.u32 %s1814_s0, 4  ;;  %s1693_s24 = int_to_ptr.vmem [resolvable:$false] %s1692_s24 }
  0x68   : > { %s1694_s15 = scalar_lea.vmem %s1693_s24, 4096  ;;  %p1695_p11 = scmp.lt.s32.totalorder %s2030_s21, %s1693_s24 }
  0x69   : > { %p1690_p8 = pnand %p1688_p0, %p1956_p2  ;;  %p1696_p4 = scmp.lt.s32.totalorder %s1694_s15, %s1687_s28 }
  0x6b   : > { %p1691_p10 = pneg %p1690_p8  ;;  %p1697_p3 = por %p1696_p4, %p1695_p11 }
  0x6d   : > { %p1698_p5 = pnand %p1697_p3, %p1691_p10 }
  0x6f   : > { %1701 = shalt.err (!%p1698_p5)
}
  0x70   : > { %s1815_s30 = smov 128   ;;  %s1816_s14 = smov 8  }
  0x71   : > { %1497 = dma.hbm_to_vmem [thread:$0]  (!%p1929_p13), %s2027_s18, 2048, %s2030_s21, %s1950_s17, %s1815_s30, %s1815_s30, %s1816_s14  }
  0x72   : > { %s2058_s29 = scalar_lea.hbm %s2268_s5, %s1938_s26  ;;  %s390_s16 = scalar_lea.vmem [#allocation8], %s1935_s25 }
  0x73   : > { %s397_s28 = sshll.u32 %s390_s16, 4  ;;  %s387_s0 = scalar_lea.sflag [#allocation9], %s1927_s22  ;;  %s2061_s28 = int_to_ptr.vmem [resolvable:$true] %s397_s28 }
  0x74   : > { %s1702_s24 = scalar_lea.hbm %s2058_s29, 2048  ;;  %s1707_s21 = scalar_lea.hbm %s2268_s5, 4096 }
  0x75   : > { %p1703_p1 = scmp.ne.s32.totalorder %s2058_s29, %s1702_s24  ;;  %p1708_p9 = scmp.lt.u32.totalorder %s2058_s29, %s2268_s5 }
  0x76   : > { %p1709_p12 = scmp.lt.u32.totalorder %s1707_s21, %s1702_s24  ;;  %p1711_p8 = scmp.lt.u32.totalorder %s1702_s24, %s2058_s29 }
  0x77   : > { %p1705_p7 = pnand %p1703_p1, %p1956_p2 }
  0x78   : > { %p1710_p0 = por %p1709_p12, %p1708_p9 }
  0x79   : > { %p1706_p6 = pneg %p1705_p7 }
  0x7a   : > { %p1712_p10 = por %p1711_p8, %p1710_p0 }
  0x7c   : > { %p1713_p11 = pnand %p1712_p10, %p1706_p6 }
  0x7e   : > { %1716 = shalt.err (!%p1713_p11)
}
  0x7f   : > { %s1717_s25 = scalar_lea.vmem %s2061_s28, 2048  ;;  %s1817_s30 = smov [#allocation8]  }
  0x80   : > { %p1718_p4 = scmp.ne.s32.totalorder %s2061_s28, %s1717_s25  ;;  %s1722_s14 = sshll.u32 %s1817_s30, 4  ;;  %s1723_s14 = int_to_ptr.vmem [resolvable:$false] %s1722_s14 }
  0x81   : > { %s1724_s1 = scalar_lea.vmem %s1723_s14, 4096  ;;  %p1725_p1 = scmp.lt.s32.totalorder %s2061_s28, %s1723_s14 }
  0x82   : > { %p1720_p3 = pnand %p1718_p4, %p1956_p2  ;;  %p1726_p7 = scmp.lt.s32.totalorder %s1724_s1, %s1717_s25 }
  0x84   : > { %p1721_p5 = pneg %p1720_p3  ;;  %p1727_p9 = por %p1726_p7, %p1725_p1 }
  0x86   : > { %p1728_p12 = pnand %p1727_p9, %p1721_p5 }
  0x88   : > { %1731 = shalt.err (!%p1728_p12)
}
  0x89   : > { %s2300_s9 = smov 4   ;;  %s2301_s16 = smov 64  }
  0x8a   : > { %1500 = dma.hbm_to_vmem [thread:$0]  (!%p1929_p13), %s2058_s29, 2048, %s2061_s28, %s387_s0, %s2301_s16, %s2301_s16, %s2300_s9  }
  0x8b   : > { %p2302_p2 = scmp.ne.s32.totalorder %s2298_s27, 0 }
  0x8c   : > { %s2093_s11 = sand.u32 (!%p2302_p2), 1, %s1798_s10   ;;  %p2303_p6 = scmp.ne.s32.totalorder (!%p2302_p2), %s2290_s19, 0 }
  0x8d   : > { %427 = sbr.rel (%p2302_p2) target bundleno = 1065 (0x429), region = 56  ;;  %s1356_s24 = sshll.u32 (!%p2302_p2), %s2093_s11, 5 }
  0x8e   : > { %s430_s17 = scalar_lea.sflag (!%p2302_p2), [#allocation3], %s2093_s11  ;;  %s2097_s23 = scalar_lea.vmem (!%p2302_p2), [#allocation2], %s1356_s24 }
  0x94   : > { %1777 = dma.done.wait (%p2303_p6), %s430_s17, 512  }
  0x95   : > { %1779 = vsyncadd (%p2303_p6), %s430_s17, 4294966784  ;;  %s438_s22 = sand.u32 1, %s1893_s13   ;;  %s1357_s27 = sshll.u32 %s2093_s11, 7 }
  0x96   : > { %s439_s29 = scalar_lea.sflag [#allocation6], %s438_s22  ;;  %s2105_s28 = scalar_lea.vmem [#allocation5], %s1357_s27 }
  0x97   : > { %1781 = dma.done.wait (%p2303_p6), %s439_s29, 4096  }
  0x98   : > { %1783 = vsyncadd (%p2303_p6), %s439_s29, 4294963200  ;;  %s2111_s0 = scalar_lea.vmem [#allocation7], %s1357_s27  ;;  %s457_s18 = scalar_lea.sflag [#allocation9], %s2093_s11 }
  0x99   : > { %s2114_s21 = scalar_lea.vmem [#allocation8], %s1357_s27 }
  0x9a   : > { %1785 = dma.done.wait (%p2303_p6), %s457_s18, 2048  }
  0x9b   : > { %1787 = vsyncadd (%p2303_p6), %s457_s18, 4294965248  ;;  %v1548_v0 = vld [vmem:[%s2105_s28 + $0x40] sm:$0xff]   ;;  %v1550_v2 = vld [vmem:[%s2105_s28 + $0x48] sm:$0xff]   ;;  %v1818_v38 = vmov 0   ;;  %p527_p13 = scmp.lt.s32.totalorder %s1893_s13, 1  ;;  %s1360_s18 = sshll.u32 %s2093_s11, 3 }
  0x9c   : > { %v1549_v1 = vld [vmem:[%s2105_s28] sm:$0xff]   ;;  %1434 = vmatprep.subr.bf16.mxu0 %v1548_v0  ;;  %v1551_v3 = vld [vmem:[%s2105_s28 + $0x8] sm:$0xff]   ;;  %v1552_v4 = vld [vmem:[%s2105_s28 + $0x50] sm:$0xff]   ;;  %870 = vmatprep.mubr.bf16.mxu1 %v1818_v38  ;;  %p2306_p8 = scmp.ne.s32.totalorder %s2291_s20, 0 }
  0x9d   : > { %1435 = vmatpush3.bf16.msra.mxu0 %v1549_v1  ;;  %v1553_v5 = vld [vmem:[%s2105_s28 + $0x10] sm:$0xff]   ;;  %v1554_v6 = vld [vmem:[%s2105_s28 + $0x58] sm:$0xff]   ;;  %v1556_v8 = vld [vmem:[%s2105_s28 + $0x60] sm:$0xff]   ;;  %s2181_s19 = scalar_select %p527_p13, %s1893_s13, 1 }
  0x9e   : > { %1436 = vmatprep.subr.bf16.mxu0 %v1550_v2  ;;  %v1555_v7 = vld [vmem:[%s2105_s28 + $0x18] sm:$0xff]   ;;  %v1557_v9 = vld [vmem:[%s2105_s28 + $0x20] sm:$0xff]   ;;  %v1558_v10 = vld [vmem:[%s2105_s28 + $0x68] sm:$0xff]  }
  0x9f   : > { %v2132_v11 = vld [vmem:[%s2097_s23 + $0x8] sm:$0xff]  ;;  %v2135_v12 = vld [vmem:[%s2097_s23 + $0x18] sm:$0xff]  ;;  %v1560_v18 = vld [vmem:[%s2105_s28 + $0x70] sm:$0xff]   ;;  %s529_s25 = scalar_lea.vmem %s2265_s2, %s2181_s19  ;;  %s1361_s30 = sshll.u32 %s2181_s19, 1 }
  0xa0   : > { %v582_v13 = vpack.c.bf16 %v2135_v12, %v2132_v11  ;;  %v1564_v14 = vld [vmem:[%s2111_s0 + $0x4] ss:$8 sps:$4 sm:$0xff]   ;;  %v1566_v15 = vld [vmem:[%s2111_s0] ss:$8 sps:$4 sm:$0xff]   ;;  %v1567_v17 = vld [vmem:[%s2111_s0 + $0x14] ss:$8 sps:$4 sm:$0xff]   ;;  %s533_s9 = scalar_lea.vmem %s2267_s4, %s1361_s30  ;;  %s536_s17 = scalar_lea.vmem %s2269_s6, %s2181_s19 }
  0xa1   : > { %1437 = vmatpush3.bf16.msra.mxu0 %v1551_v3  ;;  %v1559_v16 = vld [vmem:[%s2105_s28 + $0x28] sm:$0xff]   ;;  %838 = vmatprep.subr.bf16.mxu1 %v1564_v14  ;;  %v1569_v19 = vld [vmem:[%s2111_s0 + $0x10] ss:$8 sps:$4 sm:$0xff]   ;;  %v1573_v24 = vld [vmem:[%s2111_s0 + $0x34] ss:$8 sps:$4 sm:$0xff]   ;;  %v748_v3 = vlaneseq  ;;  %s539_s27 = scalar_lea.vmem %s2270_s7, %s2181_s19  ;;  %s2304_s30 = sld [smem:[#allocation22_spill]] }
  0xa2   : > { %1438 = vmatprep.subr.bf16.mxu0 %v1552_v4  ;;  %718 = vmatprep.mubr.bf16.mxu0 %v582_v13  ;;  %v1561_v20 = vld [vmem:[%s2105_s28 + $0x30] sm:$0xff]   ;;  %v1570_v21 = vld [vmem:[%s2111_s0 + $0x24] ss:$8 sps:$4 sm:$0xff]   ;;  %v1562_v22 = vld [vmem:[%s2105_s28 + $0x78] sm:$0xff]  }
  0xa3   : > { %839 = vmatpush1.bf16.msra.mxu1 %v1566_v15  ;;  %v1572_v23 = vld [vmem:[%s2111_s0 + $0x20] ss:$8 sps:$4 sm:$0xff]   ;;  %v1563_v25 = vld [vmem:[%s2105_s28 + $0x38] sm:$0xff]   ;;  %v2155_v27 = vld [vmem:[%s2097_s23 + $0x10] sm:$0xff]  ;;  %v749_v4 = vshrl.u32 %v748_v3, 7 }
  0xa4   : > { %840 = vmatprep.subr.bf16.mxu1 %v1567_v17  ;;  %v2152_v26 = vld [vmem:[%s2097_s23] sm:$0xff]  ;;  %v1575_v28 = vld [vmem:[%s2111_s0 + $0x30] ss:$8 sps:$4 sm:$0xff]   ;;  %v1579_v32 = vld [vmem:[%s2111_s0 + $0x54] ss:$8 sps:$4 sm:$0xff]  }
  0xa5   : > { %1439 = vmatpush3.bf16.msra.mxu0 %v1553_v5  ;;  %v1576_v29 = vld [vmem:[%s2111_s0 + $0x44] ss:$8 sps:$4 sm:$0xff]   ;;  %v581_v30 = vpack.c.bf16 %v2155_v27, %v2152_v26  ;;  %v1578_v31 = vld [vmem:[%s2111_s0 + $0x40] ss:$8 sps:$4 sm:$0xff]   ;;  %v1581_v33 = vld [vmem:[%s2111_s0 + $0x50] ss:$8 sps:$4 sm:$0xff]  }
  0xa6   : > { %1440 = vmatprep.subr.bf16.mxu0 %v1554_v6  ;;  %v1582_v34 = vld [vmem:[%s2111_s0 + $0x64] ss:$8 sps:$4 sm:$0xff]   ;;  %v1584_v35 = vld [vmem:[%s2111_s0 + $0x60] ss:$8 sps:$4 sm:$0xff]   ;;  %v1585_v36 = vld [vmem:[%s2111_s0 + $0x74] ss:$8 sps:$4 sm:$0xff]  }
  0xa7   : > { %841 = vmatpush1.bf16.msra.mxu1 %v1569_v19  ;;  %v1587_v37 = vld [vmem:[%s2111_s0 + $0x70] ss:$8 sps:$4 sm:$0xff]   ;;  %v1588_v39 = vld [vmem:[%s2114_s21 + $0x40] sm:$0xff]   ;;  %v1590_v41 = vld [vmem:[%s2114_s21 + $0x48] sm:$0xff]   ;;  %v750_v5 = vsub.s32 0, %v749_v4  ;;  %s542_s0 = scalar_lea.vmem %s2271_s8, %s2181_s19  ;;  %s525_s19 = scalar_lea.vmem [#allocation10], %s1360_s18 }
  0xa8   : > { %842 = vmatprep.subr.bf16.mxu1 %v1570_v21  ;;  %v1589_v40 = vld [vmem:[%s2114_s21] sm:$0xff]   ;;  %v1591_v42 = vld [vmem:[%s2114_s21 + $0x8] sm:$0xff]   ;;  %v1592_v43 = vld [vmem:[%s2114_s21 + $0x50] sm:$0xff]   ;;  %s1152_s26 = sshll.u32 %s525_s19, 4  ;;  %s2305_s14 = smov %s2304_s30  ;;  %s2219_s26 = int_to_ptr.vmem [resolvable:$true] %s1152_s26 }
  0xa9   : > { %1441 = vmatpush3.bf16.msra.mxu0 %v1555_v7  ;;  %v1593_v44 = vld [vmem:[%s2114_s21 + $0x10] sm:$0xff]   ;;  %v1594_v45 = vld [vmem:[%s2114_s21 + $0x58] sm:$0xff]   ;;  %v1596_v47 = vld [vmem:[%s2114_s21 + $0x60] sm:$0xff]   ;;  %v754_v7 = vsub.s32 1, %v749_v4  ;;  %s1732_s16 = scalar_lea.vmem %s2219_s26, 128 }
  0xaa   : > { %1442 = vmatprep.subr.bf16.mxu0 %v1556_v8  ;;  %v1595_v46 = vld [vmem:[%s2114_s21 + $0x18] sm:$0xff]   ;;  %v1597_v48 = vld [vmem:[%s2114_s21 + $0x20] sm:$0xff]   ;;  %v1598_v49 = vld [vmem:[%s2114_s21 + $0x68] sm:$0xff]   ;;  %p1733_p0 = scmp.ne.s32.totalorder %s2219_s26, %s1732_s16 }
  0xab   : > { %843 = vmatpush1.bf16.msra.mxu1 %v1572_v23  ;;  %v1362_v51 = vld [vmem:[%s529_s25] ss:$0 sm:$0xff]  ;;  %v1599_v62 = vld [vmem:[%s2114_s21 + $0x28] sm:$0xff]   ;;  %v1600_v63 = vld [vmem:[%s2114_s21 + $0x70] sm:$0xff]  }
  0xac   : > { %844 = vmatprep.subr.bf16.mxu1 %v1573_v24  ;;  %v1601_v0 = vld [vmem:[%s2114_s21 + $0x30] sm:$0xff]   ;;  %v1602_v1 = vld [vmem:[%s2114_s21 + $0x78] sm:$0xff]   ;;  %v746_v6 = vld [vmem:[%s533_s9] sm:$0x3]  ;;  %s1139_s9 = scalar_lea.sflag [#allocation4], %s2093_s11  ;;  %p1734_p10 = pnand %p1733_p0, %p2306_p8 }
  0xad   : > { %1443 = vmatpush3.bf16.msra.mxu0 %v1557_v9  ;;  %v1603_v2 = vld [vmem:[%s2114_s21 + $0x38] sm:$0xff]   ;;  %v751_v8 = vrot.slane %v746_v6, %v750_v5  ;;  %v755_v9 = vrot.slane %v746_v6, %v754_v7  ;;  %s1428_s21 = sshll.u32 %s1893_s13, 7  ;;  %s1819_s13 = smov [#allocation10]  }
  0xae   : > { %1444 = vmatprep.subr.bf16.mxu0 %v1558_v10  ;;  %s2217_s1 = scalar_lea.hbm %s2304_s30, %s1428_s21  ;;  %p1735_p11 = pneg %p1734_p10 }
  0xaf   : > { %845 = vmatpush1.bf16.msra.mxu1 %v1575_v28  ;;  %s1736_s24 = sshll.u32 %s1819_s13, 4  ;;  %s1737_s24 = int_to_ptr.vmem [resolvable:$false] %s1736_s24 }
  0xb0   : > { %846 = vmatprep.subr.bf16.mxu1 %v1576_v29  ;;  %v1395_v29 = vld [vmem:[%s536_s17] ss:$0 sm:$0xff]  ;;  %s1738_s17 = scalar_lea.vmem %s1737_s24, 256  ;;  %p1739_p4 = scmp.lt.s32.totalorder %s2219_s26, %s1737_s24 }
  0xb1   : > { %1445 = vmatpush3.bf16.msra.mxu0 %v1559_v16  ;;  %p1740_p3 = scmp.lt.s32.totalorder %s1738_s17, %s1732_s16 }
  0xb2   : > { %1446 = vmatprep.subr.bf16.mxu0 %v1560_v18 }
  0xb3   : > { %847 = vmatpush1.bf16.msra.mxu1 %v1578_v31  ;;  %p1741_p5 = por %p1740_p3, %p1739_p4 }
  0xb4   : > { %848 = vmatprep.subr.bf16.mxu1 %v1579_v32 }
  0xb5   : > { %1447 = vmatpush3.bf16.msra.mxu0 %v1561_v20  ;;  %p1742_p1 = pnand %p1741_p5, %p1735_p11 }
  0xb6   : > { %1448 = vmatprep.subr.bf16.mxu0 %v1562_v22 }
  0xb7   : > { %849 = vmatpush1.bf16.msra.mxu1 %v1581_v33 }
  0xb8   : > { %850 = vmatprep.subr.bf16.mxu1 %v1582_v34 }
  0xb9   : > { %1449 = vmatpush3.bf16.msra.mxu0 %v1563_v25 }
  0xba   : > { %1456 = vmatprep.subr.bf16.mxu0 %v1588_v39 }
  0xbb   : > { %851 = vmatpush1.bf16.msra.mxu1 %v1584_v35 }
  0xbc   : > { %719 = vmatmul.mubr.bf16.vlgmr.msra.gmra.mrb[0].mxu0 %v581_v30  ;;  %852 = vmatprep.subr.bf16.mxu1 %v1585_v36 }
  0xbd   : > { %1457 = vmatpush3.bf16.msra.mxu0 %v1589_v40 }
  0xbe   : > { %1458 = vmatprep.subr.bf16.mxu0 %v1590_v41 }
  0xbf   : > { %853 = vmatpush1.bf16.msra.mxu1 %v1587_v37 }
  0xc1   : > { %1459 = vmatpush3.bf16.msra.mxu0 %v1591_v42 }
  0xc2   : > { %1460 = vmatprep.subr.bf16.mxu0 %v1592_v43 }
  0xc5   : > { %1461 = vmatpush3.bf16.msra.mxu0 %v1593_v44 }
  0xc6   : > { %1462 = vmatprep.subr.bf16.mxu0 %v1594_v45 }
  0xc9   : > { %1463 = vmatpush3.bf16.msra.mxu0 %v1595_v46 }
  0xca   : > { %1464 = vmatprep.subr.bf16.mxu0 %v1596_v47 }
  0xcd   : > { %1465 = vmatpush3.bf16.msra.mxu0 %v1597_v48 }
  0xce   : > { %1466 = vmatprep.subr.bf16.mxu0 %v1598_v49 }
  0xd1   : > { %1467 = vmatpush3.bf16.msra.mxu0 %v1599_v62 }
  0xd2   : > { %1468 = vmatprep.subr.bf16.mxu0 %v1600_v63 }
  0xd5   : > { %1469 = vmatpush3.bf16.msra.mxu0 %v1601_v0 }
  0xd6   : > { %1470 = vmatprep.subr.bf16.mxu0 %v1602_v1 }
  0xd9   : > { %1471 = vmatpush3.bf16.msra.mxu0 %v1603_v2 }
 0x18f   : > { %v1450_v50 = vpop.f32.mrb[0].mxu0 }
 0x190   : > { %v1451_v52 = vpop.f32.mrb[1].mxu0 }
 0x191   : > { %v1452_v53 = vadd.f32 %v1451_v52, %v1450_v50  ;;  %v1453_v54 = vpop.f32.mrb[2].mxu0 }
 0x192   : > { %v1454_v55 = vpop.f32.mrb[3].mxu0 }
 0x193   : > { %v721_v56 = vadd.f32 %v1452_v53, %v1362_v51  ;;  %v1455_v57 = vadd.f32 %v1454_v55, %v1453_v54  ;;  %v1412_v53 = vld [vmem:[%s539_s27] ss:$0 sm:$0xff] }
 0x194   : > { %v1413_v55 = vld [vmem:[%s542_s0] ss:$0 sm:$0xff] }
 0x195   : > { %v724_v58 = vadd.f32 %v1455_v57, %v1362_v51  ;;  %v727_v59 = vmax.f32 %v721_v56, 0.0 }
 0x197   : > { %v728_v60 = vmax.f32 %v724_v58, 0.0 }
 0x199   : > { %v745_v61 = vpack.c.bf16 %v728_v60, %v727_v59 }
 0x19b   : > { %871 = vmatmul.mubr.bf16.vlgmr.msra.gmra.mrb[0].mxu1 %v745_v61 }
 0x26e   : > { %v872_v10 = vpop.f32.mrb[0].mxu1 }
 0x26f   : > { %v873_v13 = vadd.f32 %v872_v10, %v751_v8  ;;  %v874_v14 = vpop.f32.mrb[1].mxu1 }
 0x270   : > { %v875_v15 = vadd.f32 %v874_v14, %v755_v9  ;;  %v876_v16 = vpop.f32.mrb[2].mxu1 }
 0x271   : > { %v877_v17 = vadd.f32 %v876_v16, %v751_v8  ;;  %v878_v18 = vpop.f32.mrb[3].mxu1  ;;  %v881_v20 = vadd.f32 %v873_v13, %v2152_v26 }
 0x272   : > { %v879_v19 = vadd.f32 %v878_v18, %v755_v9  ;;  %v882_v22 = vadd.f32 %v875_v15, %v2132_v11 }
 0x273   : > { %v883_v21 = vadd.f32 %v877_v17, %v2155_v27 }
 0x274   : > { %v884_v23 = vadd.f32 %v879_v19, %v2135_v12 }
 0x275   : > { %v917_v24 = vpack.c.bf16 %v883_v21, %v881_v20 }
 0x276   : > { %v918_v25 = vpack.c.bf16 %v884_v23, %v882_v22 }
 0x278   : > { %1054 = vmatprep.mubr.bf16.mxu0 %v918_v25 }
 0x279   : > { %1055 = vmatmul.mubr.bf16.vlgmr.msra.gmra.mrb[4].mxu0 %v917_v24 }
 0x34c   : > { %v1472_v28 = vpop.f32.mrb[4].mxu0 }
 0x34d   : > { %v1473_v30 = vpop.f32.mrb[5].mxu0 }
 0x34e   : > { %v1474_v31 = vadd.f32 %v1473_v30, %v1472_v28  ;;  %v1475_v32 = vpop.f32.mrb[6].mxu0 }
 0x34f   : > { %v1476_v26 = vpop.f32.mrb[7].mxu0 }
 0x350   : > { %v1057_v33 = vadd.f32 %v1474_v31, %v1395_v29  ;;  %v1477_v27 = vadd.f32 %v1476_v26, %v1475_v32 }
 0x352   : > { %v1060_v34 = vadd.f32 %v1477_v27, %v1395_v29  ;;  %1065 = vadd.xlane.f32.xlu0 %v1057_v33  ;;  %v1072_v11 = vmul.f32 %v1057_v33, %v1057_v33 }
 0x354   : > { %1074 = vadd.xlane.f32.xlu1 %v1072_v11  ;;  %v1073_v12 = vmul.f32 %v1060_v34, %v1060_v34 }
 0x356   : > { %1067 = vadd.xlane.f32.xlu0 %v1060_v34 }
 0x358   : > { %1076 = vadd.xlane.f32.xlu1 %v1073_v12 }
 0x3df   : > { %v1066_v35 = vpop.xlane.xlu0 %1065 }
 0x3e0   : > { %v1070_v36 = vmul.f32 0.0078125, %v1066_v35 }
 0x3e1   : > { %v1075_v37 = vpop.xlane.xlu1 %1074 }
 0x3e2   : > { %v1080_v38 = vmul.f32 %v1070_v36, %v1070_v36  ;;  %v1078_v39 = vmul.f32 0.0078125, %v1075_v37  ;;  %v1086_v51 = vsub.f32 %v1057_v33, %v1070_v36 }
 0x3e3   : > { %v1068_v40 = vpop.xlane.xlu0 %1067 }
 0x3e4   : > { %v1082_v41 = vsub.f32 %v1078_v39, %v1080_v38  ;;  %v1071_v42 = vmul.f32 0.0078125, %v1068_v40 }
 0x3e5   : > { %v1077_v43 = vpop.xlane.xlu1 %1076 }
 0x3e6   : > { %v1084_v44 = vmax.f32 %v1082_v41, 0.0  ;;  %v1081_v45 = vmul.f32 %v1071_v42, %v1071_v42  ;;  %v1079_v46 = vmul.f32 0.0078125, %v1077_v43  ;;  %v1087_v57 = vsub.f32 %v1060_v34, %v1071_v42 }
 0x3e8   : > { %v1088_v47 = vadd.f32 1e-05, %v1084_v44  ;;  %v1083_v48 = vsub.f32 %v1079_v46, %v1081_v45 }
 0x3ea   : > { %1604 = vrsqrt.f32 %v1088_v47  ;;  %v1085_v49 = vmax.f32 %v1083_v48, 0.0 }
 0x3ec   : > { %v1089_v50 = vadd.f32 1e-05, %v1085_v49 }
 0x3ee   : > { %1606 = vrsqrt.f32 %v1089_v50 }
 0x3f4   : > { %v1605_v52 = vpop.eup %1604 }
 0x3f5   : > { %v1092_v54 = vmul.f32 %v1605_v52, %v1086_v51 }
 0x3f7   : > { %v1100_v56 = vmul.f32 %v1412_v53, %v1092_v54 }
 0x3f8   : > { %v1607_v58 = vpop.eup %1606 }
 0x3f9   : > { %v1108_v59 = vadd.f32 %v1413_v55, %v1100_v56  ;;  %v1093_v60 = vmul.f32 %v1607_v58, %v1087_v57 }
 0x3fb   : > { %v1101_v61 = vmul.f32 %v1412_v53, %v1093_v60  ;;  %v1112_v62 = vmul.f32 0.044715, %v1108_v59  ;;  %v1110_v14 = vmul.f32 0.5, %v1108_v59 }
 0x3fd   : > { %v1109_v63 = vadd.f32 %v1413_v55, %v1101_v61  ;;  %v1114_v0 = vmul.f32 %v1112_v62, %v1108_v59 }
 0x3ff   : > { %v1113_v1 = vmul.f32 0.044715, %v1109_v63  ;;  %v1116_v2 = vmul.f32 %v1114_v0, %v1108_v59  ;;  %v1111_v15 = vmul.f32 0.5, %v1109_v63 }
 0x401   : > { %v1115_v3 = vmul.f32 %v1113_v1, %v1109_v63  ;;  %v1118_v4 = vadd.f32 %v1116_v2, %v1108_v59 }
 0x403   : > { %v1117_v5 = vmul.f32 %v1115_v3, %v1109_v63  ;;  %v1120_v6 = vmul.f32 0.7978846, %v1118_v4 }
 0x405   : > { %v1119_v7 = vadd.f32 %v1117_v5, %v1109_v63  ;;  %1608 = vtanh.f32 %v1120_v6 }
 0x407   : > { %v1121_v8 = vmul.f32 0.7978846, %v1119_v7 }
 0x409   : > { %1610 = vtanh.f32 %v1121_v8 }
 0x40f   : > { %v1609_v9 = vpop.eup %1608 }
 0x410   : > { %v1124_v10 = vadd.f32 1.0, %v1609_v9 }
 0x412   : > { %v1126_v17 = vmul.f32 %v1124_v10, %v1110_v14 }
 0x413   : > { %v1611_v13 = vpop.eup %1610 }
 0x414   : > { %v1125_v16 = vadd.f32 1.0, %v1611_v13 }
 0x416   : > { %v1127_v18 = vmul.f32 %v1125_v16, %v1111_v15 }
 0x418   : > { %v1432_v19 = vpack.c.bf16 %v1127_v18, %v1126_v17 }
 0x41a   : > { %1433 = vst [vmem:[%s525_s19] sm:$0xff] %v1432_v19  }
 0x41b   : > { %1745 = shalt.err (!%p1742_p1)
}
 0x41c   : > { %s1746_s23 = scalar_lea.hbm %s2217_s1, 128  ;;  %s1750_s29 = scalar_lea.hbm %s2305_s14, 256 }
 0x41d   : > { %p1747_p7 = scmp.ne.s32.totalorder %s2217_s1, %s1746_s23  ;;  %p1751_p2 = scmp.lt.u32.totalorder %s2217_s1, %s2305_s14 }
 0x41e   : > { %p1752_p6 = scmp.lt.u32.totalorder %s1750_s29, %s1746_s23  ;;  %p1754_p0 = scmp.lt.u32.totalorder %s1746_s23, %s2217_s1 }
 0x41f   : > { %p1748_p9 = pnand %p1747_p7, %p2306_p8 }
 0x420   : > { %p1753_p13 = por %p1752_p6, %p1751_p2 }
 0x421   : > { %p1749_p12 = pneg %p1748_p9 }
 0x422   : > { %p1755_p10 = por %p1754_p0, %p1753_p13 }
 0x424   : > { %p1756_p11 = pnand %p1755_p10, %p1749_p12 }
 0x426   : > { %1759 = shalt.err (!%p1756_p11)
}
 0x427   : > { %s1820_s18 = smov 64   ;;  %s1821_s21 = smov 4  }
 0x428   : > { %1486 = dma.vmem_to_hbm [thread:$0]  (%p2306_p8), %s2219_s26, 128, %s2217_s1, %s1139_s9, %s1820_s18, %s1820_s18, %s1821_s21  }
 0x429 PF: > { %s2307_s19 = sld [smem:[#allocation15_spill]]  ;;  %s2308_s15 = sld [smem:[#allocation19_spill]] }
 0x42a   : > { %p2310_p3 = scmp.ge.s32.totalorder %s1806_s12, 2 }
 0x42f   : > { %s1167_s25 = sand.u32 1, %s2307_s19   ;;  %p2309_p4 = scmp.ne.s32.totalorder %s2308_s15, 0 }
 0x430   : > { %s1168_s30 = scalar_lea.sflag [#allocation4], %s1167_s25 }
 0x431   : > { %p1502_p5 = pnand %p2310_p3, %p2309_p4 }
 0x433   : > { %1789 = dma.done.wait (!%p1502_p5), %s1168_s30, 128  }
 0x434   : > { %1791 = vsyncadd (!%p1502_p5), %s1168_s30, 4294967168  ;;  %s2311_s12 = sld [smem:[#allocation17_spill]]  ;;  %s2312_s16 = sld [smem:[#allocation16_spill]] }
 0x435   : > { %s2313_s11 = sld [smem:[#allocation18_spill]]  ;;  %s2314_s30 = smov %s1798_s10 }
 0x43a   : > { %p28_p1 = scmp.ge.s32.totalorder %s2311_s12, 4   ;;  %s2315_s10 = smov %s2312_s16 }
 0x43c   :  { %30 = sbr.rel (!%p28_p1) target bundleno = 13 (0xd), region = 153 }
 0x443   :  { %1173 = vsyncpa [#allocation3], 1 }
 0x444   :  { %1175 = vsyncpa [#allocation3 + $0x1], 1 }
 0x445   :  { %1176 = vsyncpa [#allocation6], 1 }
 0x446   :  { %1178 = vsyncpa [#allocation6 + $0x1], 1 }
 0x447   :  { %1179 = vsyncpa [#allocation9], 1 }
 0x448   :  { %1181 = vsyncpa [#allocation9 + $0x1], 1 }
 0x449   :  { %1182 = vsyncpa [#allocation4], 1 }
 0x44a   :  { %1184 = vsyncpa [#allocation4 + $0x1], 1 }

</bundles_post_ra>
